<compile_context>
chip_gen: v6e
topology: v6e:2x2x1
jax: 0.10.0
libtpu: 0.0.40
codegen_flags: <defaults>
</compile_context>

<pallas_src>
import functools
import math

import jax
import jax.numpy as jnp
from jax.experimental import pallas as pl
from jax.experimental.pallas import tpu as pltpu

# ----------------------------- configuration ---------------------------------
IN_CH = 4
MODEL_CH = 32
OUT_CH = 4
NUM_RES = 1
CHANNEL_MULT = (1, 2)
ATTN_RES = ()            # no attention in input/output blocks; mid-block has one
NUM_HEADS = 4
CONTEXT_DIM = 16
EMB_DIM = MODEL_CH * 4   # 128
MAX_PERIOD = 10000
MERGE_ALPHA = 0.5        # merge_strategy='fixed', merge_factor=0.5
GN_GROUPS = 32


def _ceil_to(x, m):
    return ((x + m - 1) // m) * m


def _vmem_limit_bytes():
    # Generation-aware VMEM budget (v7x has only 64 MiB physical per TC).
    try:
        cap = int(pltpu.get_tpu_info().vmem_capacity_bytes)
    except Exception:
        cap = 64 * 1024 * 1024
    return min(int(cap * 0.75), 100 * 1024 * 1024)


_VMEM_LIMIT = _vmem_limit_bytes()

# Lowering-safety fallbacks (used only if a fused kernel fails to lower).
_FUSED_OK = {"conv2d": None, "conv3d": None, "attn_self": None, "attn_cross": None}


def _run_with_fallback(kind, primary, fallback):
    if _FUSED_OK[kind] is False:
        return fallback()
    try:
        out = primary()
        _FUSED_OK[kind] = True
        return out
    except Exception:                      # lowering not supported -> safe path
        _FUSED_OK[kind] = False
        return fallback()


# ----------------------------- fused matmul kernel ----------------------------
def _matmul_kernel(a_ref, b_ref, bias_ref, o_ref, *, activation):
    y = jnp.dot(a_ref[...], b_ref[...], preferred_element_type=jnp.float32)
    y = y + bias_ref[...]
    if activation == "silu":
        y = y * jax.nn.sigmoid(y)
    elif activation == "geglu":
        half = y.shape[-1] // 2
        val = y[:, :half]
        gate = y[:, half:]
        # TODO(synk): reference GEGLU uses exact (erf) GELU; tanh approximation is
        # used here because erf has no Mosaic lowering.
        y = val * jax.nn.gelu(gate, approximate=True)
    o_ref[...] = y.astype(o_ref.dtype)


@functools.lru_cache(maxsize=None)
def _matmul_call(M, K, N, tm, tn, n_out, out_block_n, activation, out_dtype):
    return pl.pallas_call(
        functools.partial(_matmul_kernel, activation=activation),
        out_shape=jax.ShapeDtypeStruct((M, n_out), out_dtype),
        grid=(pl.cdiv(M, tm), pl.cdiv(N, tn)),
        in_specs=[
            pl.BlockSpec((tm, K), lambda i, j: (i, 0)),
            pl.BlockSpec((K, tn), lambda i, j: (0, j)),
            pl.BlockSpec((1, tn), lambda i, j: (0, j)),
        ],
        out_specs=pl.BlockSpec((tm, out_block_n), lambda i, j: (i, j)),
        compiler_params=pltpu.CompilerParams(
            dimension_semantics=("parallel", "parallel"),
            vmem_limit_bytes=_VMEM_LIMIT,
        ),
    )


def pallas_matmul(a, w, bias, activation=None, out_dtype=jnp.bfloat16):
    """(M, K) @ (K, N) + bias with fused SiLU / GEGLU epilogue. bf16 MXU, f32 acc."""
    M, K = a.shape
    Kw, N = w.shape
    assert K == Kw, (K, Kw)
    assert K <= 8192, K                       # whole-K block kept in VMEM
    if a.dtype != jnp.bfloat16:
        a = a.astype(jnp.bfloat16)
    if activation == "geglu":
        assert N % 256 == 0 and N <= 4096, N  # single lane-dense N tile
        tn = N
        n_out = N // 2
        out_block_n = N // 2
    else:
        if N % 256 == 0 and N >= 512:
            tn = 256
        elif N % 128 == 0 and N > 128:
            tn = 128
        else:
            tn = N                             # full-dim block (lane-sparse store OK)
        n_out = N
        out_block_n = tn
    if M <= 8:
        tm = M
    else:
        # >= 2 grid steps on the row axis so both v7x TensorCores get work.
        tm = min(256, _ceil_to((M + 1) // 2, 8))
    return _matmul_call(M, K, N, tm, tn, n_out, out_block_n, activation,
                        out_dtype)(a, w, bias)


# ----------------------------- fused conv kernels -----------------------------
def _conv2d_kernel(x_ref, w_ref, b_ref, o_ref, *, k, Ho, Wo):
    # x_ref: (1, Hp, Wp, C) bf16, w_ref: (k*k*C, Cout) bf16, b_ref: (1, Cout) f32,
    # o_ref: (1, Ho*Wo, Cout).  One MXU dot per kernel offset, f32 accumulation.
    C = x_ref.shape[-1]
    Cout = o_ref.shape[-1]
    acc = jnp.zeros((Ho * Wo, Cout), jnp.float32)
    idx = 0
    for ky in range(k):
        for kx in range(k):
            patch = x_ref[0, ky:ky + Ho, kx:kx + Wo, :].reshape(Ho * Wo, C)
            acc = acc + jnp.dot(patch, w_ref[idx * C:(idx + 1) * C, :],
                                preferred_element_type=jnp.float32)
            idx += 1
    o_ref[0] = (acc + b_ref[...]).astype(o_ref.dtype)


@functools.lru_cache(maxsize=None)
def _conv2d_call(N, Hp, Wp, C, Ho, Wo, Cout, k, out_dtype):
    return pl.pallas_call(
        functools.partial(_conv2d_kernel, k=k, Ho=Ho, Wo=Wo),
        out_shape=jax.ShapeDtypeStruct((N, Ho * Wo, Cout), out_dtype),
        grid=(N,),
        in_specs=[
            pl.BlockSpec((1, Hp, Wp, C), lambda i: (i, 0, 0, 0)),
            pl.BlockSpec((k * k * C, Cout), lambda i: (0, 0)),
            pl.BlockSpec((1, Cout), lambda i: (0, 0)),
        ],
        out_specs=pl.BlockSpec((1, Ho * Wo, Cout), lambda i: (i, 0, 0)),
        compiler_params=pltpu.CompilerParams(
            dimension_semantics=("parallel",),
            vmem_limit_bytes=_VMEM_LIMIT,
        ),
    )


def _conv3d_kernel(x_ref, w_ref, b_ref, o_ref, *, k, T, H, W):
    C = x_ref.shape[-1]
    Cout = o_ref.shape[-1]
    acc = jnp.zeros((T * H * W, Cout), jnp.float32)
    idx = 0
    for kt in range(k):
        for ky in range(k):
            for kx in range(k):
                patch = x_ref[0, kt:kt + T, ky:ky + H, kx:kx + W, :].reshape(
                    T * H * W, C)
                acc = acc + jnp.dot(patch, w_ref[idx * C:(idx + 1) * C, :],
                                    preferred_element_type=jnp.float32)
                idx += 1
    o_ref[0] = (acc + b_ref[...]).astype(o_ref.dtype)


@functools.lru_cache(maxsize=None)
def _conv3d_call(N, Tp, Hp, Wp, C, T, H, W, Cout, k, out_dtype):
    return pl.pallas_call(
        functools.partial(_conv3d_kernel, k=k, T=T, H=H, W=W),
        out_shape=jax.ShapeDtypeStruct((N, T * H * W, Cout), out_dtype),
        grid=(N,),
        in_specs=[
            pl.BlockSpec((1, Tp, Hp, Wp, C), lambda i: (i, 0, 0, 0, 0)),
            pl.BlockSpec((k * k * k * C, Cout), lambda i: (0, 0)),
            pl.BlockSpec((1, Cout), lambda i: (0, 0)),
        ],
        out_specs=pl.BlockSpec((1, T * H * W, Cout), lambda i: (i, 0, 0)),
        compiler_params=pltpu.CompilerParams(
            dimension_semantics=("parallel",),
            vmem_limit_bytes=_VMEM_LIMIT,
        ),
    )


def _conv2d_im2col(p, xp, N, Ho, Wo, C, k, stride, out_dtype):
    pats = [xp[:, ky:ky + stride * (Ho - 1) + 1:stride,
               kx:kx + stride * (Wo - 1) + 1:stride, :]
            for ky in range(k) for kx in range(k)]
    cols = jnp.concatenate(pats, axis=-1).reshape(N * Ho * Wo, k * k * C)
    out = pallas_matmul(cols, p["w"], p["b"], out_dtype=out_dtype)
    return out.reshape(N, Ho, Wo, p["cout"])


def conv2d_apply(p, x, stride=1, out_dtype=jnp.bfloat16):
    k = p["k"]
    pad = (k - 1) // 2
    N, H, W, C = x.shape
    x = x.astype(jnp.bfloat16)
    if k == 1 and stride == 1:
        out = pallas_matmul(x.reshape(N * H * W, C), p["w"], p["b"],
                            out_dtype=out_dtype)
        return out.reshape(N, H, W, p["cout"])
    xp = jnp.pad(x, ((0, 0), (pad, pad), (pad, pad), (0, 0)))
    Hp, Wp = H + 2 * pad, W + 2 * pad
    Ho = (Hp - k) // stride + 1
    Wo = (Wp - k) // stride + 1
    if stride != 1:
        # TODO(synk): fold the strided patch gather into the fused conv kernel.
        return _conv2d_im2col(p, xp, N, Ho, Wo, C, k, stride, out_dtype)

    def primary():
        out = _conv2d_call(N, Hp, Wp, C, Ho, Wo, p["cout"], k, out_dtype)(
            xp, p["w"], p["b"])
        return out.reshape(N, Ho, Wo, p["cout"])

    return _run_with_fallback(
        "conv2d", primary,
        lambda: _conv2d_im2col(p, xp, N, Ho, Wo, C, k, 1, out_dtype))


def _conv3d_im2col(p, xp, b, T, H, W, C, k, out_dtype):
    pats = [xp[:, kt:kt + T, ky:ky + H, kx:kx + W, :]
            for kt in range(k) for ky in range(k) for kx in range(k)]
    cols = jnp.concatenate(pats, axis=-1).reshape(b * T * H * W, k * k * k * C)
    out = pallas_matmul(cols, p["w"], p["b"], out_dtype=out_dtype)
    return out.reshape(b, T, H, W, p["cout"])


def conv3d_apply(p, x, out_dtype=jnp.bfloat16):
    k = p["k"]
    pad = (k - 1) // 2
    b, T, H, W, C = x.shape
    x = x.astype(jnp.bfloat16)
    xp = jnp.pad(x, ((0, 0), (pad, pad), (pad, pad), (pad, pad), (0, 0)))
    Tp, Hp, Wp = T + 2 * pad, H + 2 * pad, W + 2 * pad

    def primary():
        out = _conv3d_call(b, Tp, Hp, Wp, C, T, H, W, p["cout"], k, out_dtype)(
            xp, p["w"], p["b"])
        return out.reshape(b, T, H, W, p["cout"])

    return _run_with_fallback(
        "conv3d", primary,
        lambda: _conv3d_im2col(p, xp, b, T, H, W, C, k, out_dtype))


# ----------------------------- group norm kernel ------------------------------
def _groupnorm_kernel(x_ref, g_ref, b_ref, c2g_ref, g2c_ref, o_ref,
                      *, eps, inv_count, silu, per_channel):
    x = x_ref[0].astype(jnp.float32)                            # (S, C)
    s1 = jnp.sum(x, axis=0, keepdims=True)                      # (1, C)
    if per_channel:
        mean_c = s1 * inv_count
    else:
        mean_g = jnp.dot(s1, c2g_ref[...],
                         preferred_element_type=jnp.float32) * inv_count
        mean_c = jnp.dot(mean_g, g2c_ref[...],
                         preferred_element_type=jnp.float32)
    xc = x - mean_c
    s2 = jnp.sum(xc * xc, axis=0, keepdims=True)
    if per_channel:
        rstd_c = jax.lax.rsqrt(s2 * inv_count + eps)
    else:
        var_g = jnp.dot(s2, c2g_ref[...],
                        preferred_element_type=jnp.float32) * inv_count
        rstd_c = jnp.dot(jax.lax.rsqrt(var_g + eps), g2c_ref[...],
                         preferred_element_type=jnp.float32)
    y = xc * rstd_c * g_ref[...] + b_ref[...]
    if silu:
        y = y * jax.nn.sigmoid(y)
    o_ref[0] = y.astype(o_ref.dtype)


@functools.lru_cache(maxsize=None)
def _groupnorm_call(N, S, C, G, eps, silu):
    per_channel = (C == G)
    inv_count = 1.0 / float(S * (C // G))
    # TODO(synk): for real SVD resolutions S is large; a tiled two-pass variant
    # would be needed to respect the v7x VMEM ceiling.
    return pl.pallas_call(
        functools.partial(_groupnorm_kernel, eps=eps, inv_count=inv_count,
                          silu=silu, per_channel=per_channel),
        out_shape=jax.ShapeDtypeStruct((N, S, C), jnp.bfloat16),
        grid=(N,),
        in_specs=[
            pl.BlockSpec((1, S, C), lambda i: (i, 0, 0)),
            pl.BlockSpec((1, C), lambda i: (0, 0)),
            pl.BlockSpec((1, C), lambda i: (0, 0)),
            pl.BlockSpec((C, G), lambda i: (0, 0)),
            pl.BlockSpec((G, C), lambda i: (0, 0)),
        ],
        out_specs=pl.BlockSpec((1, S, C), lambda i: (i, 0, 0)),
        compiler_params=pltpu.CompilerParams(
            dimension_semantics=("parallel",),
            vmem_limit_bytes=_VMEM_LIMIT,
        ),
    )


@functools.lru_cache(maxsize=None)
def _group_maps(C, G):
    cg = C // G
    c2g = (jnp.arange(C)[:, None] // cg == jnp.arange(G)[None, :]).astype(jnp.float32)
    return c2g, c2g.T


def groupnorm_apply(p, x, eps=1e-5, silu=False, groups=GN_GROUPS):
    shape = x.shape
    C = shape[-1]
    assert C % groups == 0, (C, groups)
    N = shape[0]
    S = 1
    for d in shape[1:-1]:
        S *= d
    x3 = x.reshape(N, S, C).astype(jnp.bfloat16)
    c2g, g2c = _group_maps(C, groups)
    y = _groupnorm_call(N, S, C, groups, float(eps), bool(silu))(
        x3, p["g"], p["b"], c2g, g2c)
    return y.reshape(shape)


# ----------------------------- layer norm kernel ------------------------------
def _layernorm_kernel(x_ref, g_ref, b_ref, o_ref, *, eps):
    x = x_ref[...].astype(jnp.float32)
    mean = jnp.mean(x, axis=-1, keepdims=True)
    xc = x - mean
    var = jnp.mean(xc * xc, axis=-1, keepdims=True)
    y = xc * jax.lax.rsqrt(var + eps) * g_ref[...] + b_ref[...]
    o_ref[...] = y.astype(o_ref.dtype)


@functools.lru_cache(maxsize=None)
def _layernorm_call(R, C, tr, eps):
    return pl.pallas_call(
        functools.partial(_layernorm_kernel, eps=eps),
        out_shape=jax.ShapeDtypeStruct((R, C), jnp.bfloat16),
        grid=(pl.cdiv(R, tr),),
        in_specs=[
            pl.BlockSpec((tr, C), lambda i: (i, 0)),
            pl.BlockSpec((1, C), lambda i: (0, 0)),
            pl.BlockSpec((1, C), lambda i: (0, 0)),
        ],
        out_specs=pl.BlockSpec((tr, C), lambda i: (i, 0)),
        compiler_params=pltpu.CompilerParams(
            dimension_semantics=("parallel",),
            vmem_limit_bytes=_VMEM_LIMIT,
        ),
    )


def layernorm_apply(p, x, eps=1e-5):
    shape = x.shape
    C = shape[-1]
    x2 = x.reshape(-1, C).astype(jnp.bfloat16)
    R = x2.shape[0]
    tr = R if R <= 8 else min(256, _ceil_to((R + 1) // 2, 8))
    y = _layernorm_call(R, C, tr, float(eps))(x2, p["g"], p["b"])
    return y.reshape(shape)


# ----------------------------- attention kernels ------------------------------
def _attn_self_kernel(qkv_ref, o_ref, *, heads, dh):
    # qkv_ref: (1, S, 3*inner) bf16 with the softmax scale folded into Q columns.
    inner = heads * dh
    for h in range(heads):
        q = qkv_ref[0, :, h * dh:(h + 1) * dh]
        k = qkv_ref[0, :, inner + h * dh:inner + (h + 1) * dh]
        v = qkv_ref[0, :, 2 * inner + h * dh:2 * inner + (h + 1) * dh]
        s = jnp.dot(q, k.T, preferred_element_type=jnp.float32)
        s = s - jnp.max(s, axis=-1, keepdims=True)
        p = jnp.exp(s)
        p = p * pl.reciprocal(jnp.sum(p, axis=-1, keepdims=True), approx=True)
        o = jnp.dot(p.astype(jnp.bfloat16), v, preferred_element_type=jnp.float32)
        o_ref[0, :, h * dh:(h + 1) * dh] = o.astype(o_ref.dtype)


def _attn_cross_kernel(q_ref, kv_ref, o_ref, *, heads, dh):
    inner = heads * dh
    for h in range(heads):
        q = q_ref[0, :, h * dh:(h + 1) * dh]
        k = kv_ref[0, :, h * dh:(h + 1) * dh]
        v = kv_ref[0, :, inner + h * dh:inner + (h + 1) * dh]
        s = jnp.dot(q, k.T, preferred_element_type=jnp.float32)
        s = s - jnp.max(s, axis=-1, keepdims=True)
        p = jnp.exp(s)
        p = p * pl.reciprocal(jnp.sum(p, axis=-1, keepdims=True), approx=True)
        o = jnp.dot(p.astype(jnp.bfloat16), v, preferred_element_type=jnp.float32)
        o_ref[0, :, h * dh:(h + 1) * dh] = o.astype(o_ref.dtype)


@functools.lru_cache(maxsize=None)
def _attn_self_call(B, S, inner, heads, dh):
    # TODO(synk): whole-sequence blocks; a flash-style KV-tiled variant is needed
    # for real SVD resolutions (v7x VMEM ceiling).
    return pl.pallas_call(
        functools.partial(_attn_self_kernel, heads=heads, dh=dh),
        out_shape=jax.ShapeDtypeStruct((B, S, inner), jnp.bfloat16),
        grid=(B,),
        in_specs=[pl.BlockSpec((1, S, 3 * inner), lambda i: (i, 0, 0))],
        out_specs=pl.BlockSpec((1, S, inner), lambda i: (i, 0, 0)),
        compiler_params=pltpu.CompilerParams(
            dimension_semantics=("parallel",),
            vmem_limit_bytes=_VMEM_LIMIT,
        ),
    )


@functools.lru_cache(maxsize=None)
def _attn_cross_call(B, S, Skv, inner, heads, dh):
    return pl.pallas_call(
        functools.partial(_attn_cross_kernel, heads=heads, dh=dh),
        out_shape=jax.ShapeDtypeStruct((B, S, inner), jnp.bfloat16),
        grid=(B,),
        in_specs=[pl.BlockSpec((1, S, inner), lambda i: (i, 0, 0)),
                  pl.BlockSpec((1, Skv, 2 * inner), lambda i: (i, 0, 0))],
        out_specs=pl.BlockSpec((1, S, inner), lambda i: (i, 0, 0)),
        compiler_params=pltpu.CompilerParams(
            dimension_semantics=("parallel",),
            vmem_limit_bytes=_VMEM_LIMIT,
        ),
    )


def _sdpa_xla(q, k, v, heads, dh):
    # Safety-net path only (used if the Pallas attention kernel fails to lower).
    B, S, inner = q.shape
    Skv = k.shape[1]
    qh = q.reshape(B, S, heads, dh).astype(jnp.float32)
    kh = k.reshape(B, Skv, heads, dh).astype(jnp.float32)
    vh = v.reshape(B, Skv, heads, dh).astype(jnp.float32)
    s = jnp.einsum('bqhd,bkhd->bhqk', qh, kh)
    p = jax.nn.softmax(s, axis=-1)
    o = jnp.einsum('bhqk,bkhd->bqhd', p, vh)
    return o.reshape(B, S, inner).astype(jnp.bfloat16)


# ----------------------------- parameter init --------------------------------
class ParamFactory:
    def __init__(self, key):
        self._key = key
        self._n = 0

    def normal(self, shape, scale=0.05):
        self._n += 1
        k = jax.random.fold_in(self._key, self._n)
        return scale * jax.random.normal(k, shape, jnp.float32)


def make_linear(pf, din, dout):
    return {"w": pf.normal((din, dout)).astype(jnp.bfloat16),
            "b": jnp.zeros((1, dout), jnp.float32)}


def make_conv2d(pf, cin, cout, k):
    # weight pre-packed for the per-offset dots: rows ordered (ky, kx, cin)
    return {"w": pf.normal((k * k * cin, cout)).astype(jnp.bfloat16),
            "b": jnp.zeros((1, cout), jnp.float32), "k": k, "cout": cout}


def make_conv3d(pf, cin, cout, k):
    return {"w": pf.normal((k * k * k * cin, cout)).astype(jnp.bfloat16),
            "b": jnp.zeros((1, cout), jnp.float32), "k": k, "cout": cout}


def make_norm(pf, ch):
    return {"g": jnp.ones((1, ch), jnp.float32), "b": jnp.zeros((1, ch), jnp.float32)}


def make_resblock2d(pf, ch, emb_ch, out_ch):
    return {
        "in_norm": make_norm(pf, ch),
        "in_conv": make_conv2d(pf, ch, out_ch, 3),
        "emb_lin": make_linear(pf, emb_ch, out_ch),
        "out_norm": make_norm(pf, out_ch),
        "out_conv": make_conv2d(pf, out_ch, out_ch, 3),
        "skip": None if ch == out_ch else make_conv2d(pf, ch, out_ch, 1),
    }


def make_resblock3d(pf, ch, emb_ch):
    return {
        "in_norm": make_norm(pf, ch),
        "in_conv": make_conv3d(pf, ch, ch, 3),
        "emb_lin": make_linear(pf, emb_ch, ch),
        "out_norm": make_norm(pf, ch),
        "out_conv": make_conv3d(pf, ch, ch, 3),
    }


def make_video_resblock(pf, ch, emb_ch, out_ch):
    out_ch = out_ch or ch
    return {"spatial": make_resblock2d(pf, ch, emb_ch, out_ch),
            "temporal": make_resblock3d(pf, out_ch, emb_ch),
            "alpha": MERGE_ALPHA}


def make_attn(pf, qdim, ctx_dim, heads, dh, self_attn):
    inner = heads * dh
    scale = dh ** -0.5
    p = {"heads": heads, "dim_head": dh, "to_out": make_linear(pf, inner, qdim)}
    if self_attn:
        w = pf.normal((qdim, 3 * inner))
        w = w.at[:, :inner].multiply(scale)          # fold softmax scale into Q
        p["w_qkv"] = w.astype(jnp.bfloat16)
        p["b_qkv"] = jnp.zeros((1, 3 * inner), jnp.float32)
    else:
        p["w_q"] = (pf.normal((qdim, inner)) * scale).astype(jnp.bfloat16)
        p["b_q"] = jnp.zeros((1, inner), jnp.float32)
        p["w_kv"] = pf.normal((ctx_dim, 2 * inner)).astype(jnp.bfloat16)
        p["b_kv"] = jnp.zeros((1, 2 * inner), jnp.float32)
    return p


def make_ff(pf, dim):
    inner = dim * 4
    # proj columns ordered [value | gate] to match the fused GEGLU epilogue.
    return {"proj": make_linear(pf, dim, inner * 2),
            "out": make_linear(pf, inner, dim)}


def make_basic_block(pf, dim, heads, dh, ctx_dim):
    return {
        "norm1": make_norm(pf, dim),
        "attn1": make_attn(pf, dim, dim, heads, dh, self_attn=True),
        "norm2": make_norm(pf, dim),
        "attn2": make_attn(pf, dim, ctx_dim, heads, dh, self_attn=False),
        "norm3": make_norm(pf, dim),
        "ff": make_ff(pf, dim),
    }


def make_video_block(pf, dim, heads, dh):
    # VideoTransformerBlock: inner_dim passed -> ff_in active, is_res True,
    # time_context_dim=None -> attn2 is self-attention.
    return {
        "norm_in": make_norm(pf, dim),
        "ff_in": make_ff(pf, dim),
        "norm1": make_norm(pf, dim),
        "attn1": make_attn(pf, dim, dim, heads, dh, self_attn=True),
        "norm2": make_norm(pf, dim),
        "attn2": make_attn(pf, dim, dim, heads, dh, self_attn=True),
        "norm3": make_norm(pf, dim),
        "ff": make_ff(pf, dim),
    }


def make_svt(pf, ch, heads, dh, ctx_dim):
    inner = heads * dh
    return {
        "in_channels": ch,
        "norm": make_norm(pf, ch),                          # eps=1e-6
        "proj_in": make_linear(pf, ch, inner),
        "time_pos_embed": {"l1": make_linear(pf, ch, ch * 4),
                           "l2": make_linear(pf, ch * 4, inner)},
        "block": make_basic_block(pf, inner, heads, dh, ctx_dim),
        "time_block": make_video_block(pf, inner, heads, dh),
        "alpha": MERGE_ALPHA,
        "proj_out": make_linear(pf, inner, ch),
    }


def build_unet(pf):
    params = {"time_embed": {"l1": make_linear(pf, MODEL_CH, EMB_DIM),
                             "l2": make_linear(pf, EMB_DIM, EMB_DIM)}}
    input_blocks = [[("conv", make_conv2d(pf, IN_CH, MODEL_CH, 3))]]
    input_block_chans = [MODEL_CH]
    ch, ds = MODEL_CH, 1
    for level, mult in enumerate(CHANNEL_MULT):
        for _ in range(NUM_RES):
            layers = [("vres", make_video_resblock(pf, ch, EMB_DIM, mult * MODEL_CH))]
            ch = mult * MODEL_CH
            if ds in ATTN_RES:
                layers.append(("attn", make_svt(pf, ch, NUM_HEADS, ch // NUM_HEADS,
                                                CONTEXT_DIM)))
            input_blocks.append(layers)
            input_block_chans.append(ch)
        if level != len(CHANNEL_MULT) - 1:
            ds *= 2
            input_blocks.append([("down", make_conv2d(pf, ch, ch, 3))])
            input_block_chans.append(ch)
    params["input_blocks"] = input_blocks

    dim_head = ch // NUM_HEADS
    params["middle_block"] = [
        ("vres", make_video_resblock(pf, ch, EMB_DIM, ch)),
        ("attn", make_svt(pf, ch, NUM_HEADS, dim_head, CONTEXT_DIM)),
        ("vres", make_video_resblock(pf, ch, EMB_DIM, ch)),
    ]

    output_blocks = []
    for level, mult in list(enumerate(CHANNEL_MULT))[::-1]:
        for i in range(NUM_RES + 1):
            ich = input_block_chans.pop()
            layers = [("vres", make_video_resblock(pf, ch + ich, EMB_DIM,
                                                   MODEL_CH * mult))]
            ch = MODEL_CH * mult
            if ds in ATTN_RES:
                layers.append(("attn", make_svt(pf, ch, NUM_HEADS, ch // NUM_HEADS,
                                                CONTEXT_DIM)))
            if level and i == NUM_RES:
                ds //= 2
                layers.append(("up", make_conv2d(pf, ch, ch, 3)))
            output_blocks.append(layers)
    params["output_blocks"] = output_blocks

    params["out_norm"] = make_norm(pf, ch)
    params["out_conv"] = make_conv2d(pf, MODEL_CH, OUT_CH, 3)
    return params


# ----------------------------- forward ops ------------------------------------
def linear_apply(p, x, activation=None, out_dtype=jnp.bfloat16):
    shape = x.shape
    out = pallas_matmul(x.reshape(-1, shape[-1]), p["w"], p["b"],
                        activation=activation, out_dtype=out_dtype)
    return out.reshape(shape[:-1] + (out.shape[-1],))


def mlp_apply(p, x):
    h = linear_apply(p["l1"], x, activation="silu")   # SiLU fused in epilogue
    return linear_apply(p["l2"], h)


def timestep_embedding(t, dim, max_period=MAX_PERIOD):
    half = dim // 2
    freqs = jnp.exp(-math.log(max_period) *
                    jnp.arange(half, dtype=jnp.float32) / half)
    args = t.astype(jnp.float32)[:, None] * freqs[None]
    return jnp.concatenate([jnp.cos(args), jnp.sin(args)], axis=-1)


def resblock2d_apply(p, x, emb_silu):
    h = groupnorm_apply(p["in_norm"], x, silu=True)
    h = conv2d_apply(p["in_conv"], h)
    emb_out = linear_apply(p["emb_lin"], emb_silu)
    h = h + emb_out[:, None, None, :]
    h = groupnorm_apply(p["out_norm"], h, silu=True)
    h = conv2d_apply(p["out_conv"], h)
    skip = x if p["skip"] is None else conv2d_apply(p["skip"], x)
    return skip + h


def resblock3d_apply(p, x, emb_silu_bt):
    # x: (b, T, H, W, C); exchange_temb_dims=True -> emb broadcast over H, W.
    h = groupnorm_apply(p["in_norm"], x, silu=True)
    h = conv3d_apply(p["in_conv"], h)
    b, t, ec = emb_silu_bt.shape
    emb_out = linear_apply(p["emb_lin"], emb_silu_bt.reshape(b * t, ec))
    h = h + emb_out.reshape(b, t, 1, 1, -1)
    h = groupnorm_apply(p["out_norm"], h, silu=True)
    h = conv3d_apply(p["out_conv"], h)
    return x + h


def video_resblock_apply(p, x, emb_silu, T):
    x = resblock2d_apply(p["spatial"], x, emb_silu)
    B, H, W, C = x.shape
    b = B // T
    x5 = x.reshape(b, T, H, W, C)                     # free reshape (channels-last)
    x_t = resblock3d_apply(p["temporal"], x5, emb_silu.reshape(b, T, -1))
    a = p["alpha"]
    y = a * x5 + (1.0 - a) * x_t                      # AlphaBlender 'fixed'
    return y.reshape(B, H, W, C)


def attention_apply(p, x, context=None):
    B, S, C = x.shape
    h, dh = p["heads"], p["dim_head"]
    inner = h * dh
    if context is None:
        qkv = pallas_matmul(x.reshape(B * S, C), p["w_qkv"],
                            p["b_qkv"]).reshape(B, S, 3 * inner)
        o = _run_with_fallback(
            "attn_self",
            lambda: _attn_self_call(B, S, inner, h, dh)(qkv),
            lambda: _sdpa_xla(qkv[..., :inner], qkv[..., inner:2 * inner],
                              qkv[..., 2 * inner:], h, dh))
    else:
        Skv = context.shape[1]
        q = pallas_matmul(x.reshape(B * S, C), p["w_q"],
                          p["b_q"]).reshape(B, S, inner)
        kv = pallas_matmul(context.reshape(B * Skv, context.shape[-1]),
                           p["w_kv"], p["b_kv"]).reshape(B, Skv, 2 * inner)
        o = _run_with_fallback(
            "attn_cross",
            lambda: _attn_cross_call(B, S, Skv, inner, h, dh)(q, kv),
            lambda: _sdpa_xla(q, kv[..., :inner], kv[..., inner:], h, dh))
    return linear_apply(p["to_out"], o)


def ff_apply(p, x):
    shape = x.shape
    x2 = x.reshape(-1, shape[-1])
    h = pallas_matmul(x2, p["proj"]["w"], p["proj"]["b"], activation="geglu")
    out = pallas_matmul(h, p["out"]["w"], p["out"]["b"])
    return out.reshape(shape)


def basic_block_apply(p, x, context):
    x = attention_apply(p["attn1"], layernorm_apply(p["norm1"], x), None) + x
    x = attention_apply(p["attn2"], layernorm_apply(p["norm2"], x), context) + x
    x = ff_apply(p["ff"], layernorm_apply(p["norm3"], x)) + x
    return x


def video_block_apply(p, x, T):
    B, S, C = x.shape
    b = B // T
    x = x.reshape(b, T, S, C).transpose(0, 2, 1, 3).reshape(b * S, T, C)
    x_skip = x
    x = ff_apply(p["ff_in"], layernorm_apply(p["norm_in"], x)) + x_skip
    x = attention_apply(p["attn1"], layernorm_apply(p["norm1"], x), None) + x
    x = attention_apply(p["attn2"], layernorm_apply(p["norm2"], x), None) + x
    x_skip = x
    x = ff_apply(p["ff"], layernorm_apply(p["norm3"], x)) + x_skip
    return x.reshape(b, S, T, C).transpose(0, 2, 1, 3).reshape(B, S, C)


def svt_apply(p, x, context, T):
    # SpatialVideoTransformer (use_linear=True, depth=1, time_context=None)
    B, H, W, C = x.shape
    x_in = x
    h = groupnorm_apply(p["norm"], x, eps=1e-6, silu=False)
    h = h.reshape(B, H * W, C)                        # free reshape (channels-last)
    h = linear_apply(p["proj_in"], h)
    num_frames = jnp.tile(jnp.arange(T, dtype=jnp.float32), B // T)
    t_emb = timestep_embedding(num_frames, p["in_channels"])
    emb = mlp_apply(p["time_pos_embed"], t_emb)[:, None, :]
    h = basic_block_apply(p["block"], h, context)
    h_mix = video_block_apply(p["time_block"], h + emb, T)
    a = p["alpha"]
    h = a * h + (1.0 - a) * h_mix                     # AlphaBlender 'fixed'
    h = linear_apply(p["proj_out"], h)
    h = h.reshape(B, H, W, C)
    return h + x_in


def upsample_apply(p, x):
    N, H, W, C = x.shape
    x = jnp.broadcast_to(x[:, :, None, :, None, :],
                         (N, H, 2, W, 2, C)).reshape(N, 2 * H, 2 * W, C)
    return conv2d_apply(p, x)


def apply_sequential(layers, h, emb_silu, context, T):
    for kind, p in layers:
        if kind == "conv":
            h = conv2d_apply(p, h)
        elif kind == "vres":
            h = video_resblock_apply(p, h, emb_silu, T)
        elif kind == "attn":
            h = svt_apply(p, h, context, T)
        elif kind == "down":
            h = conv2d_apply(p, h, stride=2)
        elif kind == "up":
            h = upsample_apply(p, h)
    return h


def video_unet_forward(params, x, timesteps, context, num_video_frames,
                       image_only_indicator=None):
    # image_only_indicator is unused by the 'fixed' merge strategy.
    del image_only_indicator
    T = num_video_frames
    t_emb = timestep_embedding(timesteps, MODEL_CH)
    emb = mlp_apply(params["time_embed"], t_emb)           # (B, 128) bf16
    emb_silu = jax.nn.silu(emb)                            # shared by all resblocks
    context = context.astype(jnp.bfloat16)
    h = jnp.transpose(x, (0, 2, 3, 1)).astype(jnp.bfloat16)   # NCHW -> NHWC once
    hs = []
    for blk in params["input_blocks"]:
        h = apply_sequential(blk, h, emb_silu, context, T)
        hs.append(h)
    h = apply_sequential(params["middle_block"], h, emb_silu, context, T)
    for blk in params["output_blocks"]:
        h = jnp.concatenate([h, hs.pop()], axis=-1)        # channel concat (NHWC)
        h = apply_sequential(blk, h, emb_silu, context, T)
    h = groupnorm_apply(params["out_norm"], h, silu=True)
    h = conv2d_apply(params["out_conv"], h, out_dtype=jnp.float32)
    return jnp.transpose(h, (0, 3, 1, 2))                  # back to NCHW


# ----------------------------- driver -----------------------------------------
if __name__ == "__main__":
    key = jax.random.PRNGKey(0)
    kx, kc = jax.random.split(key)
    b, T = 1, 2
    B = b * T
    H = W = 8
    x = jax.random.normal(kx, (B, IN_CH, H, W), jnp.float32)
    timesteps = jnp.array([3.0, 7.0], jnp.float32)
    context = jax.random.normal(kc, (B, 4, CONTEXT_DIM), jnp.float32)
    image_only_indicator = jnp.zeros((b, T), jnp.float32)

    params = build_unet(ParamFactory(jax.random.PRNGKey(42)))
    out = video_unet_forward(params, x, timesteps, context, T, image_only_indicator)
    out = jax.block_until_ready(out)
    assert out.shape == (B, OUT_CH, H, W), out.shape
    assert bool(jnp.all(jnp.isfinite(out)))
    print("KERNEL_OK")
</pallas_src>

<mosaic_0001>
module attributes {stable_mosaic.version = 11 : i64} {
  func.func @_matmul_kernel(%arg0: i32, %arg1: i32, %arg2: memref<2x32xbf16, #tpu.memory_space<vmem>>, %arg3: memref<32x128xbf16, #tpu.memory_space<vmem>>, %arg4: memref<1x128xf32, #tpu.memory_space<vmem>>, %arg5: memref<2x128xbf16, #tpu.memory_space<vmem>>) attributes {dimension_semantics = [#tpu.dimension_semantics<parallel>, #tpu.dimension_semantics<parallel>], iteration_bounds = array<i64: 1, 1>, scalar_prefetch = 0 : i64, scratch_operands = 0 : i64, tpu.core_type = #tpu.core_type<tc>, window_params = [{transform_indices = @transform_0, window_bounds = array<i64: 2, 32>}, {transform_indices = @transform_1, window_bounds = array<i64: 32, 128>}, {transform_indices = @transform_2, window_bounds = array<i64: 1, 128>}, {transform_indices = @transform_3, window_bounds = array<i64: 2, 128>}]} {
    %c0 = arith.constant 0 : index
    %c0_0 = arith.constant 0 : index
    %0 = vector.load %arg2[%c0, %c0_0] : memref<2x32xbf16, #tpu.memory_space<vmem>>, vector<2x32xbf16>
    %c0_1 = arith.constant 0 : index
    %c0_2 = arith.constant 0 : index
    %1 = vector.load %arg3[%c0_1, %c0_2] : memref<32x128xbf16, #tpu.memory_space<vmem>>, vector<32x128xbf16>
    %cst = arith.constant dense<0.000000e+00> : vector<2x128xf32>
    %2 = tpu.matmul %0, %1, %cst {dimension_numbers = #tpu.dot_dimension_numbers<[1], [0], [0], [1], [0, 0, 1, 1], [], []>} : vector<2x32xbf16>, vector<32x128xbf16>, vector<2x128xf32> -> vector<2x128xf32>
    %c0_3 = arith.constant 0 : index
    %c0_4 = arith.constant 0 : index
    %3 = vector.load %arg4[%c0_3, %c0_4] : memref<1x128xf32, #tpu.memory_space<vmem>>, vector<1x128xf32>
    %4 = vector.broadcast %3 : vector<1x128xf32> to vector<2x128xf32>
    %5 = arith.addf %2, %4 : vector<2x128xf32>
    %6 = arith.negf %5 : vector<2x128xf32>
    %7 = math.exp %6 : vector<2x128xf32>
    %cst_5 = arith.constant 1.000000e+00 : f32
    %8 = vector.broadcast %cst_5 : f32 to vector<2x128xf32>
    %9 = arith.addf %8, %7 : vector<2x128xf32>
    %10 = arith.divf %8, %9 : vector<2x128xf32>
    %11 = arith.mulf %5, %10 : vector<2x128xf32>
    %12 = arith.truncf %11 : vector<2x128xf32> to vector<2x128xbf16>
    %c0_6 = arith.constant 0 : index
    %c0_7 = arith.constant 0 : index
    %13 = vector.load %arg5[%c0_6, %c0_7] : memref<2x128xbf16, #tpu.memory_space<vmem>>, vector<2x128xbf16>
    tpu.vector_store %arg5[%c0_6, %c0_7], %12 {strides = array<i32>} : memref<2x128xbf16, #tpu.memory_space<vmem>>, vector<2x128xbf16>,
    return
  }
  func.func @transform_0(%arg0: i32, %arg1: i32) -> (i32, i32) {
    %c0_i32 = arith.constant 0 : i32
    %c0_i32_0 = arith.constant 0 : i32
    return %arg0, %c0_i32 : i32, i32
  }
  func.func @transform_1(%arg0: i32, %arg1: i32) -> (i32, i32) {
    %c0_i32 = arith.constant 0 : i32
    %c0_i32_0 = arith.constant 0 : i32
    return %c0_i32, %arg1 : i32, i32
  }
  func.func @transform_2(%arg0: i32, %arg1: i32) -> (i32, i32) {
    %c0_i32 = arith.constant 0 : i32
    %c0_i32_0 = arith.constant 0 : i32
    return %c0_i32, %arg1 : i32, i32
  }
  func.func @transform_3(%arg0: i32, %arg1: i32) -> (i32, i32) {
    %c0_i32 = arith.constant 0 : i32
    return %arg0, %arg1 : i32, i32
  }
}

</mosaic_0001>

<bundles_post_ra>
// kernel: tpu_custom_call.1
= control target key start
LH: loop header
LB: loop body
LE: loop exit
PB: predicated region body
PF: predicated region fallthrough
CT: control target
= control target key end

     0   :  { %8 = vsyncpa [#allocation3], 0  ;;  %s269_s0 = inlined_call_operand.hbm [shape: bf16[2,32], index: 0, kind: input, shape index: {}]   ;;  %s270_s1 = inlined_call_operand.hbm [shape: bf16[32,128], index: 1, kind: input, shape index: {}]   ;;  %s271_s2 = inlined_call_operand.vmem [shape: f32[1,128], index: 2, kind: input, shape index: {}]   ;;  %s272_s3 = inlined_call_operand.hbm [shape: bf16[2,128], index: 3, kind: output, shape index: {}]  }
   0x1   :  { %9 = vsyncpa [#allocation6], 0 }
   0x2   :  { %10 = vsyncpa [#allocation4], 0  ;;  %s230_s12 = smov [#allocation2]   ;;  %s231_s14 = smov [#allocation5]  }
   0x3   :  { %s17_s13 = sshll.u32 %s230_s12, 4  ;;  %s26_s15 = sshll.u32 %s231_s14, 4  ;;  %s18_s13 = int_to_ptr.vmem [resolvable:$true] %s17_s13  ;;  %s27_s15 = int_to_ptr.vmem [resolvable:$true] %s26_s15 }
   0x4   :  { %s172_s16 = scalar_lea.vmem %s18_s13, 16  ;;  %s176_s17 = scalar_lea.vmem %s18_s13, 32 }
   0x5   :  { %p173_p0 = scmp.ne.s32.totalorder %s18_s13, %s172_s16  ;;  %p177_p1 = scmp.lt.s32.totalorder %s18_s13, %s18_s13 }
   0x6   :  { %p178_p2 = scmp.lt.s32.totalorder %s176_s17, %s172_s16 }
   0x8   :  { %p179_p3 = por %p178_p2, %p177_p1 }
   0xa   :  { %p180_p4 = pnand %p179_p3, %p173_p0 }
   0xc   :  { %183 = shalt.err (!%p180_p4)
}
   0xd   :  { %20 = dma.hbm_to_vmem [thread:$0]  %s269_s0, 16, %s18_s13, [#allocation3]  }
   0xe   :  { %s192_s20 = scalar_lea.vmem %s27_s15, 256  ;;  %p197_p6 = scmp.lt.s32.totalorder %s27_s15, %s27_s15 }
   0xf   :  { %p193_p5 = scmp.ne.s32.totalorder %s27_s15, %s192_s20  ;;  %p198_p7 = scmp.lt.s32.totalorder %s192_s20, %s192_s20 }
  0x11   :  { %p199_p8 = por %p198_p7, %p197_p6 }
  0x13   :  { %p200_p9 = pnand %p199_p8, %p193_p5 }
  0x15   :  { %203 = shalt.err (!%p200_p9)
}
  0x16   :  { %s232_s21 = smov 64   ;;  %s233_s22 = smov 4  }
  0x17   :  { %32 = dma.hbm_to_vmem [thread:$0]  %s270_s1, 256, %s27_s15, [#allocation6], %s232_s21, %s232_s21, %s233_s22  }
  0x18   :  { %224 = dma.done.wait [#allocation3], 16  }
  0x19   :  { %225 = vsyncadd [#allocation3], 4294967280 }
  0x1a   :  { %226 = dma.done.wait [#allocation6], 256  }
  0x1b   :  { %227 = vsyncadd [#allocation6], 4294967040  ;;  %v234_v0 = vmov 0.0   ;;  %vm235_vm0 = vmmov 0   ;;  %v158_v1 = vld [vmem:[#allocation5 + $0x8] sm:$0xff]   ;;  %v159_v2 = vld [vmem:[#allocation5] sm:$0xff]  }
  0x1c   :  { %143 = vmatprep.subr.bf16.mxu0 %v234_v0  ;;  %147 = vmatprep.mubr.msk.bf16.mxu0 %vm235_vm0, %v234_v0  ;;  %v42_v3 = vld [vmem:[#allocation2] sm:$0x1]  ;;  %vm66_vm1 = vcmask 261120   ;;  %s236_s1 = smov [#allocation7]  }
  0x1d   :  { %144 = vmatpush3.bf16.msra.mxu0 %v158_v1  ;;  %v135_v4 = vld [vmem:[%s271_s2] ss:$0 sm:$0xff]  ;;  %s125_s26 = sshll.u32 %s236_s1, 4  ;;  %s126_s26 = int_to_ptr.vmem [resolvable:$true] %s125_s26 }
  0x1e   :  { %145 = vmatprep.subr.bf16.mxu0 %v234_v0  ;;  %s204_s27 = scalar_lea.vmem %s126_s26, 16  ;;  %s208_s2 = scalar_lea.vmem %s126_s26, 32 }
  0x1f   :  { %p205_p10 = scmp.ne.s32.totalorder %s126_s26, %s204_s27  ;;  %p209_p11 = scmp.lt.s32.totalorder %s126_s26, %s126_s26 }
  0x20   :  { %p210_p12 = scmp.lt.s32.totalorder %s208_s2, %s204_s27 }
  0x21   :  { %146 = vmatpush3.bf16.msra.mxu0 %v159_v2 }
  0x22   :  { %p211_p13 = por %p210_p12, %p209_p11 }
  0x24   :  { %148 = vmatmul.mubr.msk.bf16.vlgmr.msra.gmra.mxu0 %vm66_vm1, %v42_v3  ;;  %p212_p0 = pnand %p211_p13, %p205_p10 }
  0xe4   :  { %v104_v5 = vpop.f32.mrf.mxu0 }
  0xe5   :  { %v105_v6 = vadd.f32 %v135_v4, %v104_v5 }
  0xe6   :  { %v149_v7 = vpop.f32.mrf.mxu0 }
  0xe7   :  { %v139_v8 = vmul.f32 -1.442695, %v105_v6 }
  0xe8   :  { %v107_v9 = vpop.f32.mrf.mxu0 }
  0xe9   :  { %160 = vpow2.f32 %v139_v8 }
  0xea   :  { %v150_v10 = vpop.f32.mrf.mxu0 }
  0xf6   :  { %v161_v11 = vpop.eup %160 }
  0xf7   :  { %v113_v12 = vadd.f32 1.0, %v161_v11 }
  0xf9   :  { %162 = vrcp.f32 %v113_v12 }
 0x106   :  { %v163_v13 = vpop.eup %162 }
 0x107   :  { %v116_v14 = vmul.f32 %v163_v13, %v105_v6 }
 0x109   :  { %v117_v15 = vpack.c.bf16 %v116_v14, %v116_v14 }
 0x10b   :  { %118 = vst [vmem:[#allocation7] sm:$0x1] %v117_v15 }
 0x10c   :  { %215 = shalt.err (!%p212_p0)
}
 0x10d   :  { %128 = dma.vmem_to_hbm [thread:$0]  %s126_s26, 16, %s272_s3, [#allocation4]  }
 0x10e   :  { %228 = dma.done.wait [#allocation4], 16  }
 0x10f   :  { %229 = vsyncadd [#allocation4], 4294967280 }
 0x110   :  { %132 = vsyncpa [#allocation3], 1 }
 0x111   :  { %133 = vsyncpa [#allocation6], 1 }
 0x112   :  { %134 = vsyncpa [#allocation4], 1 }

</bundles_post_ra>
